<compile_context>
chip_gen: v7x
topology: tpu7x:2x2x1
jax: 0.10.0
libtpu: 0.0.40
codegen_flags: <defaults>
</compile_context>

<pallas_src>
import functools

import jax
import jax.numpy as jnp
from jax import lax
from jax.experimental import pallas as pl
from jax.experimental.pallas import tpu as pltpu

BN_EPS = 1e-5


def _round_up(v, m):
    return ((v + m - 1) // m) * m


def costnet_kernel(x_ref, w1_ref, gamma_ref, beta_ref, w2_ref, b2_ref,
                   o_ref, sum_sc, sumsq_sc, scale_sc, shift_sc, *, inv_n):
    p = pl.program_id(0)     # 0: accumulate batch stats, 1: normalize + head
    i = pl.program_id(1)     # batch tile index

    # fc1 (bias omitted: it cancels exactly under training-mode BatchNorm and
    # keeps zero-padded rows at exactly h == 0).
    h = jnp.dot(x_ref[...], w1_ref[...],
                preferred_element_type=jnp.float32)            # (TB, H) f32

    @pl.when((p == 0) & (i == 0))
    def _init_stats():
        sum_sc[...] = jnp.zeros_like(sum_sc)
        sumsq_sc[...] = jnp.zeros_like(sumsq_sc)

    @pl.when(p == 0)
    def _accumulate_stats():
        sum_sc[...] += jnp.sum(h, axis=0, keepdims=True)
        sumsq_sc[...] += jnp.sum(h * h, axis=0, keepdims=True)

    @pl.when((p == 1) & (i == 0))
    def _finalize_stats():
        mean = sum_sc[...] * inv_n                             # (1, H)
        var = jnp.maximum(sumsq_sc[...] * inv_n - mean * mean, 0.0)
        scale = gamma_ref[...] * lax.rsqrt(var + BN_EPS)
        scale_sc[...] = scale
        shift_sc[...] = beta_ref[...] - mean * scale

    @pl.when(p == 1)
    def _normalize_and_head():
        h_bn = h * scale_sc[...] + shift_sc[...]               # BN as one FMA
        h_relu = jnp.maximum(h_bn, 0.0)
        # fc2: (1,H) contracted with (TB,H) on H -> (1,TB); result is already
        # lane-dense so the store is an unmasked full-lane vst.
        y = lax.dot_general(w2_ref[...], h_relu,
                            (((1,), (1,)), ((), ())),
                            preferred_element_type=jnp.float32)
        y = y + b2_ref[0, 0]
        o_ref[...] = pl.reciprocal(1.0 + jnp.exp(-y),
                                   approx=False).astype(o_ref.dtype)


def costnet_forward(x, params, *, block_b=512, matmul_dtype=None):
    """CostNet forward. x: (B, latent) float32 -> (B, 1) float32."""
    B, D = x.shape
    H = params["w1"].shape[1]

    # Batch tile: multiple of 128 so the lane-dense output block is unmasked.
    tb = _round_up(min(block_b, _round_up(B, 128)), 128)
    B_pad = _round_up(B, tb)
    num_tiles = B_pad // tb

    w1 = params["w1"]
    if matmul_dtype is not None:          # e.g. jnp.bfloat16 on v6e / v7x
        x = x.astype(matmul_dtype)
        w1 = w1.astype(matmul_dtype)
    if B_pad != B:
        # Zero rows contribute exactly 0 to sum / sum-of-squares (no fc1 bias
        # in-kernel), so batch statistics stay those of the true B rows.
        x = jnp.pad(x, ((0, B_pad - B), (0, 0)))

    kernel = functools.partial(costnet_kernel, inv_n=1.0 / B)

    out = pl.pallas_call(
        kernel,
        out_shape=jax.ShapeDtypeStruct((1, B_pad), jnp.float32),
        grid_spec=pltpu.PrefetchScalarGridSpec(
            num_scalar_prefetch=0,
            grid=(2, num_tiles),   # (pass, batch tile); pass 0 = stats
            in_specs=[
                pl.BlockSpec((tb, D), lambda p, i: (i, 0)),      # x tile
                pl.BlockSpec((D, H), lambda p, i: (0, 0)),       # w1 resident
                pl.BlockSpec((1, H), lambda p, i: (0, 0)),       # gamma
                pl.BlockSpec((1, H), lambda p, i: (0, 0)),       # beta
                pl.BlockSpec((1, H), lambda p, i: (0, 0)),       # w2 row
                pl.BlockSpec(memory_space=pltpu.MemorySpace.SMEM),  # b2 scalar
            ],
            out_specs=pl.BlockSpec((1, tb), lambda p, i: (0, i)),
            scratch_shapes=[
                pltpu.VMEM((1, H), jnp.float32),   # sum
                pltpu.VMEM((1, H), jnp.float32),   # sum of squares
                pltpu.VMEM((1, H), jnp.float32),   # BN scale
                pltpu.VMEM((1, H), jnp.float32),   # BN shift
            ],
        ),
        compiler_params=pltpu.CompilerParams(
            # Batch stats are carried in VMEM scratch across tiles, so both
            # grid axes must stay sequential (single-core accumulation).
            dimension_semantics=("arbitrary", "arbitrary"),
        ),
    )(x, w1, params["gamma"], params["beta"], params["w2"], params["b2"])

    return out[0, :B].reshape(B, 1)


def init_params(key, latent_size=64):
    """PyTorch-default-style init (uniform +/- 1/sqrt(fan_in))."""
    hidden = latent_size // 2
    k1, k2, k3, k4 = jax.random.split(key, 4)
    bound1 = 1.0 / jnp.sqrt(latent_size)
    bound2 = 1.0 / jnp.sqrt(hidden)
    return {
        # fc1 weight stored (in, out) = (D, H); PyTorch stores (out, in).
        "w1": jax.random.uniform(k1, (latent_size, hidden), jnp.float32,
                                 -bound1, bound1),
        # fc1 bias: kept for module fidelity / reference only; the kernel
        # omits it because it cancels exactly under training-mode BatchNorm.
        "b1": jax.random.uniform(k2, (1, hidden), jnp.float32,
                                 -bound1, bound1),
        "gamma": jnp.ones((1, hidden), jnp.float32),
        "beta": jnp.zeros((1, hidden), jnp.float32),
        # fc2 weight kept in PyTorch layout (out=1, in=H) = (1, H).
        "w2": jax.random.uniform(k3, (1, hidden), jnp.float32,
                                 -bound2, bound2),
        "b2": jax.random.uniform(k4, (1, 1), jnp.float32, -bound2, bound2),
    }


def reference_forward(x, params):
    """Pure-JAX reference with full PyTorch semantics (including fc1 bias)."""
    h = x @ params["w1"] + params["b1"]
    mean = jnp.mean(h, axis=0, keepdims=True)
    var = jnp.mean((h - mean) ** 2, axis=0, keepdims=True)
    h = (h - mean) * lax.rsqrt(var + BN_EPS)
    h = h * params["gamma"] + params["beta"]
    h = jnp.maximum(h, 0.0)
    y = h @ params["w2"].T + params["b2"]
    return jax.nn.sigmoid(y)


if __name__ == "__main__":
    key = jax.random.PRNGKey(0)
    pkey, xkey1, xkey2 = jax.random.split(key, 3)

    latent_size = 64
    params = init_params(pkey, latent_size)

    # Case 1: multiple batch tiles (exercises cross-tile BN stat accumulation).
    x1 = jax.random.normal(xkey1, (256, latent_size), jnp.float32)
    out1 = jax.block_until_ready(costnet_forward(x1, params, block_b=128))
    ref1 = reference_forward(x1, params)
    assert out1.shape == (256, 1)
    assert jnp.allclose(out1, ref1, atol=1e-5, rtol=1e-5)

    # Case 2: batch not a multiple of the tile (exercises zero-padding path).
    x2 = jax.random.normal(xkey2, (8, latent_size), jnp.float32)
    out2 = jax.block_until_ready(costnet_forward(x2, params))
    ref2 = reference_forward(x2, params)
    assert out2.shape == (8, 1)
    assert jnp.allclose(out2, ref2, atol=1e-5, rtol=1e-5)

    print("KERNEL_OK")
</pallas_src>

<mosaic_0001>
module attributes {stable_mosaic.version = 11 : i64} {
  func.func @costnet_kernel(%arg0: i32, %arg1: i32, %arg2: memref<128x64xf32, #tpu.memory_space<vmem>>, %arg3: memref<64x32xf32, #tpu.memory_space<vmem>>, %arg4: memref<1x32xf32, #tpu.memory_space<vmem>>, %arg5: memref<1x32xf32, #tpu.memory_space<vmem>>, %arg6: memref<1x32xf32, #tpu.memory_space<vmem>>, %arg7: memref<1x1xf32, #tpu.memory_space<smem>>, %arg8: memref<1x128xf32, #tpu.memory_space<vmem>>, %arg9: memref<1x32xf32, #tpu.memory_space<vmem>>, %arg10: memref<1x32xf32, #tpu.memory_space<vmem>>, %arg11: memref<1x32xf32, #tpu.memory_space<vmem>>, %arg12: memref<1x32xf32, #tpu.memory_space<vmem>>) attributes {dimension_semantics = [#tpu.dimension_semantics<arbitrary>, #tpu.dimension_semantics<arbitrary>], iteration_bounds = array<i64: 2, 2>, scalar_prefetch = 0 : i64, scratch_operands = 4 : i64, tpu.core_type = #tpu.core_type<tc>, window_params = [{transform_indices = @transform_0, window_bounds = array<i64: 128, 64>}, {pipeline_mode = #tpu.pipeline_mode<synchronous>, transform_indices = @transform_1, window_bounds = array<i64: 64, 32>}, {pipeline_mode = #tpu.pipeline_mode<synchronous>, transform_indices = @transform_2, window_bounds = array<i64: 1, 32>}, {pipeline_mode = #tpu.pipeline_mode<synchronous>, transform_indices = @transform_3, window_bounds = array<i64: 1, 32>}, {pipeline_mode = #tpu.pipeline_mode<synchronous>, transform_indices = @transform_4, window_bounds = array<i64: 1, 32>}, {transform_indices = @transform_5, window_bounds = array<i64: 1, 1>}, {transform_indices = @transform_6, window_bounds = array<i64: 1, 128>}]} {
    %c0 = arith.constant 0 : index
    %c0_0 = arith.constant 0 : index
    %0 = vector.load %arg2[%c0, %c0_0] : memref<128x64xf32, #tpu.memory_space<vmem>>, vector<128x64xf32>
    %c0_1 = arith.constant 0 : index
    %c0_2 = arith.constant 0 : index
    %1 = vector.load %arg3[%c0_1, %c0_2] : memref<64x32xf32, #tpu.memory_space<vmem>>, vector<64x32xf32>
    %cst = arith.constant dense<0.000000e+00> : vector<128x32xf32>
    %2 = tpu.matmul %0, %1, %cst {dimension_numbers = #tpu.dot_dimension_numbers<[1], [0], [0], [1], [0, 0, 1, 1], [], []>} : vector<128x64xf32>, vector<64x32xf32>, vector<128x32xf32> -> vector<128x32xf32>
    %c0_i32 = arith.constant 0 : i32
    %3 = arith.cmpi eq, %arg0, %c0_i32 : i32
    %c0_i32_3 = arith.constant 0 : i32
    %4 = arith.cmpi eq, %arg1, %c0_i32_3 : i32
    %5 = arith.andi %3, %4 : i1
    %6 = arith.extui %5 : i1 to i32
    %c0_i32_4 = arith.constant 0 : i32
    %7 = arith.cmpi ne, %6, %c0_i32_4 : i32
    scf.if %7 {
      %cst_11 = arith.constant 0.000000e+00 : f32
      %19 = vector.broadcast %cst_11 : f32 to vector<1x32xf32>
      %c0_12 = arith.constant 0 : index
      %c0_13 = arith.constant 0 : index
      %20 = vector.load %arg9[%c0_12, %c0_13] : memref<1x32xf32, #tpu.memory_space<vmem>>, vector<1x32xf32>
      tpu.vector_store %arg9[%c0_12, %c0_13], %19 {strides = array<i32>} : memref<1x32xf32, #tpu.memory_space<vmem>>, vector<1x32xf32>,
      %cst_14 = arith.constant 0.000000e+00 : f32
      %21 = vector.broadcast %cst_14 : f32 to vector<1x32xf32>
      %c0_15 = arith.constant 0 : index
      %c0_16 = arith.constant 0 : index
      %22 = vector.load %arg10[%c0_15, %c0_16] : memref<1x32xf32, #tpu.memory_space<vmem>>, vector<1x32xf32>
      tpu.vector_store %arg10[%c0_15, %c0_16], %21 {strides = array<i32>} : memref<1x32xf32, #tpu.memory_space<vmem>>, vector<1x32xf32>,
    } else {
    }
    %c0_i32_5 = arith.constant 0 : i32
    %8 = arith.cmpi eq, %arg0, %c0_i32_5 : i32
    %9 = arith.extui %8 : i1 to i32
    %c0_i32_6 = arith.constant 0 : i32
    %10 = arith.cmpi ne, %9, %c0_i32_6 : i32
    scf.if %10 {
      %c0_11 = arith.constant 0 : index
      %c0_12 = arith.constant 0 : index
      %19 = vector.load %arg9[%c0_11, %c0_12] : memref<1x32xf32, #tpu.memory_space<vmem>>, vector<1x32xf32>
      %cst_13 = arith.constant dense<0.000000e+00> : vector<32xf32>
      %20 = vector.multi_reduction <add>, %2, %cst_13 [0] : vector<128x32xf32> to vector<32xf32>
      %21 = vector.shape_cast %20 : vector<32xf32> to vector<1x32xf32>
      %22 = arith.addf %19, %21 : vector<1x32xf32>
      %c0_14 = arith.constant 0 : index
      %c0_15 = arith.constant 0 : index
      %23 = vector.load %arg9[%c0_14, %c0_15] : memref<1x32xf32, #tpu.memory_space<vmem>>, vector<1x32xf32>
      tpu.vector_store %arg9[%c0_14, %c0_15], %22 {strides = array<i32>} : memref<1x32xf32, #tpu.memory_space<vmem>>, vector<1x32xf32>,
      %c0_16 = arith.constant 0 : index
      %c0_17 = arith.constant 0 : index
      %24 = vector.load %arg10[%c0_16, %c0_17] : memref<1x32xf32, #tpu.memory_space<vmem>>, vector<1x32xf32>
      %25 = arith.mulf %2, %2 : vector<128x32xf32>
      %cst_18 = arith.constant dense<0.000000e+00> : vector<32xf32>
      %26 = vector.multi_reduction <add>, %25, %cst_18 [0] : vector<128x32xf32> to vector<32xf32>
      %27 = vector.shape_cast %26 : vector<32xf32> to vector<1x32xf32>
      %28 = arith.addf %24, %27 : vector<1x32xf32>
      %c0_19 = arith.constant 0 : index
      %c0_20 = arith.constant 0 : index
      %29 = vector.load %arg10[%c0_19, %c0_20] : memref<1x32xf32, #tpu.memory_space<vmem>>, vector<1x32xf32>
      tpu.vector_store %arg10[%c0_19, %c0_20], %28 {strides = array<i32>} : memref<1x32xf32, #tpu.memory_space<vmem>>, vector<1x32xf32>,
    } else {
    }
    %c1_i32 = arith.constant 1 : i32
    %11 = arith.cmpi eq, %arg0, %c1_i32 : i32
    %c0_i32_7 = arith.constant 0 : i32
    %12 = arith.cmpi eq, %arg1, %c0_i32_7 : i32
    %13 = arith.andi %11, %12 : i1
    %14 = arith.extui %13 : i1 to i32
    %c0_i32_8 = arith.constant 0 : i32
    %15 = arith.cmpi ne, %14, %c0_i32_8 : i32
    scf.if %15 {
      %c0_11 = arith.constant 0 : index
      %c0_12 = arith.constant 0 : index
      %19 = vector.load %arg9[%c0_11, %c0_12] : memref<1x32xf32, #tpu.memory_space<vmem>>, vector<1x32xf32>
      %cst_13 = arith.constant 3.906250e-03 : f32
      %20 = vector.broadcast %cst_13 : f32 to vector<1x32xf32>
      %21 = arith.mulf %19, %20 : vector<1x32xf32>
      %c0_14 = arith.constant 0 : index
      %c0_15 = arith.constant 0 : index
      %22 = vector.load %arg10[%c0_14, %c0_15] : memref<1x32xf32, #tpu.memory_space<vmem>>, vector<1x32xf32>
      %cst_16 = arith.constant 3.906250e-03 : f32
      %23 = vector.broadcast %cst_16 : f32 to vector<1x32xf32>
      %24 = arith.mulf %22, %23 : vector<1x32xf32>
      %25 = arith.mulf %21, %21 : vector<1x32xf32>
      %26 = arith.subf %24, %25 : vector<1x32xf32>
      %cst_17 = arith.constant 0.000000e+00 : f32
      %27 = vector.broadcast %cst_17 : f32 to vector<1x32xf32>
      %28 = arith.maximumf %26, %27 : vector<1x32xf32>
      %c0_18 = arith.constant 0 : index
      %c0_19 = arith.constant 0 : index
      %29 = vector.load %arg4[%c0_18, %c0_19] : memref<1x32xf32, #tpu.memory_space<vmem>>, vector<1x32xf32>
      %cst_20 = arith.constant 9.99999974E-6 : f32
      %30 = vector.broadcast %cst_20 : f32 to vector<1x32xf32>
      %31 = arith.addf %28, %30 : vector<1x32xf32>
      %32 = math.rsqrt %31 : vector<1x32xf32>
      %33 = arith.mulf %29, %32 : vector<1x32xf32>
      %c0_21 = arith.constant 0 : index
      %c0_22 = arith.constant 0 : index
      %34 = vector.load %arg11[%c0_21, %c0_22] : memref<1x32xf32, #tpu.memory_space<vmem>>, vector<1x32xf32>
      tpu.vector_store %arg11[%c0_21, %c0_22], %33 {strides = array<i32>} : memref<1x32xf32, #tpu.memory_space<vmem>>, vector<1x32xf32>,
      %c0_23 = arith.constant 0 : index
      %c0_24 = arith.constant 0 : index
      %35 = vector.load %arg5[%c0_23, %c0_24] : memref<1x32xf32, #tpu.memory_space<vmem>>, vector<1x32xf32>
      %36 = arith.mulf %21, %33 : vector<1x32xf32>
      %37 = arith.subf %35, %36 : vector<1x32xf32>
      %c0_25 = arith.constant 0 : index
      %c0_26 = arith.constant 0 : index
      %38 = vector.load %arg12[%c0_25, %c0_26] : memref<1x32xf32, #tpu.memory_space<vmem>>, vector<1x32xf32>
      tpu.vector_store %arg12[%c0_25, %c0_26], %37 {strides = array<i32>} : memref<1x32xf32, #tpu.memory_space<vmem>>, vector<1x32xf32>,
    } else {
    }
    %c1_i32_9 = arith.constant 1 : i32
    %16 = arith.cmpi eq, %arg0, %c1_i32_9 : i32
    %17 = arith.extui %16 : i1 to i32
    %c0_i32_10 = arith.constant 0 : i32
    %18 = arith.cmpi ne, %17, %c0_i32_10 : i32
    scf.if %18 {
      %c0_11 = arith.constant 0 : index
      %c0_12 = arith.constant 0 : index
      %19 = vector.load %arg11[%c0_11, %c0_12] : memref<1x32xf32, #tpu.memory_space<vmem>>, vector<1x32xf32>
      %20 = vector.broadcast %19 : vector<1x32xf32> to vector<128x32xf32>
      %21 = arith.mulf %2, %20 : vector<128x32xf32>
      %c0_13 = arith.constant 0 : index
      %c0_14 = arith.constant 0 : index
      %22 = vector.load %arg12[%c0_13, %c0_14] : memref<1x32xf32, #tpu.memory_space<vmem>>, vector<1x32xf32>
      %23 = vector.broadcast %22 : vector<1x32xf32> to vector<128x32xf32>
      %24 = arith.addf %21, %23 : vector<128x32xf32>
      %cst_15 = arith.constant 0.000000e+00 : f32
      %25 = vector.broadcast %cst_15 : f32 to vector<128x32xf32>
      %26 = arith.maximumf %24, %25 : vector<128x32xf32>
      %c0_16 = arith.constant 0 : index
      %c0_17 = arith.constant 0 : index
      %27 = vector.load %arg6[%c0_16, %c0_17] : memref<1x32xf32, #tpu.memory_space<vmem>>, vector<1x32xf32>
      %cst_18 = arith.constant dense<0.000000e+00> : vector<1x128xf32>
      %28 = tpu.matmul %27, %26, %cst_18 {dimension_numbers = #tpu.dot_dimension_numbers<[1], [1], [0], [0], [0, 0, 1, 0], [], []>} : vector<1x32xf32>, vector<128x32xf32>, vector<1x128xf32> -> vector<1x128xf32>
      %c0_19 = arith.constant 0 : index
      %c0_20 = arith.constant 0 : index
      %29 = memref.load %arg7[%c0_19, %c0_20] : memref<1x1xf32, #tpu.memory_space<smem>>
      %30 = vector.broadcast %29 : f32 to vector<1x128xf32>
      %31 = arith.addf %28, %30 : vector<1x128xf32>
      %cst_21 = arith.constant 0.000000e+00 : f32
      %32 = vector.broadcast %cst_21 : f32 to vector<1x128xf32>
      %33 = arith.subf %32, %31 : vector<1x128xf32>
      %34 = math.exp %33 : vector<1x128xf32>
      %cst_22 = arith.constant 1.000000e+00 : f32
      %35 = vector.broadcast %cst_22 : f32 to vector<1x128xf32>
      %36 = arith.addf %35, %34 : vector<1x128xf32>
      %37 = tpu.reciprocal %36 : vector<1x128xf32> -> vector<1x128xf32>
      %c0_23 = arith.constant 0 : index
      %c0_24 = arith.constant 0 : index
      %38 = vector.load %arg8[%c0_23, %c0_24] : memref<1x128xf32, #tpu.memory_space<vmem>>, vector<1x128xf32>
      tpu.vector_store %arg8[%c0_23, %c0_24], %37 {strides = array<i32>} : memref<1x128xf32, #tpu.memory_space<vmem>>, vector<1x128xf32>,
    } else {
    }
    return
  }
  func.func @transform_0(%arg0: i32, %arg1: i32) -> (i32, i32) {
    %c0_i32 = arith.constant 0 : i32
    %c0_i32_0 = arith.constant 0 : i32
    return %arg1, %c0_i32 : i32, i32
  }
  func.func @transform_1(%arg0: i32, %arg1: i32) -> (i32, i32) {
    %c0_i32 = arith.constant 0 : i32
    %c0_i32_0 = arith.constant 0 : i32
    %c0_i32_1 = arith.constant 0 : i32
    return %c0_i32, %c0_i32_0 : i32, i32
  }
  func.func @transform_2(%arg0: i32, %arg1: i32) -> (i32, i32) {
    %c0_i32 = arith.constant 0 : i32
    %c0_i32_0 = arith.constant 0 : i32
    %c0_i32_1 = arith.constant 0 : i32
    return %c0_i32, %c0_i32_0 : i32, i32
  }
  func.func @transform_3(%arg0: i32, %arg1: i32) -> (i32, i32) {
    %c0_i32 = arith.constant 0 : i32
    %c0_i32_0 = arith.constant 0 : i32
    %c0_i32_1 = arith.constant 0 : i32
    return %c0_i32, %c0_i32_0 : i32, i32
  }
  func.func @transform_4(%arg0: i32, %arg1: i32) -> (i32, i32) {
    %c0_i32 = arith.constant 0 : i32
    %c0_i32_0 = arith.constant 0 : i32
    %c0_i32_1 = arith.constant 0 : i32
    return %c0_i32, %c0_i32_0 : i32, i32
  }
  func.func @transform_5(%arg0: i32, %arg1: i32) -> (i32, i32) {
    %c0_i32 = arith.constant 0 : i32
    %c0_i32_0 = arith.constant 0 : i32
    %c0_i32_1 = arith.constant 0 : i32
    return %c0_i32, %c0_i32_0 : i32, i32
  }
  func.func @transform_6(%arg0: i32, %arg1: i32) -> (i32, i32) {
    %c0_i32 = arith.constant 0 : i32
    %c0_i32_0 = arith.constant 0 : i32
    return %c0_i32, %arg1 : i32, i32
  }
}

</mosaic_0001>

<bundles_post_ra>
// kernel: tpu_custom_call.1
= control target key start
LH: loop header
LB: loop body
LE: loop exit
PB: predicated region body
PF: predicated region fallthrough
CT: control target
= control target key end

     0   :  { %s1742_s0 = inlined_call_operand.vmem [shape: f32[256,64], index: 0, kind: input, shape index: {}]   ;;  %s1743_s1 = inlined_call_operand.vmem [shape: f32[64,32], index: 1, kind: input, shape index: {}]   ;;  %s1744_s2 = inlined_call_operand.vmem [shape: f32[1,32], index: 2, kind: input, shape index: {}]   ;;  %s1745_s3 = inlined_call_operand.vmem [shape: f32[1,32], index: 3, kind: input, shape index: {}]   ;;  %s1746_s4 = inlined_call_operand.vmem [shape: f32[1,32], index: 4, kind: input, shape index: {}]   ;;  %s1747_s5 = inlined_call_operand.<no memory space> [shape: f32[1,1], index: 5, kind: input, shape index: {}]   ;;  %s1748_s6 = inlined_call_operand.hbm [shape: f32[1,256], index: 6, kind: output, shape index: {}]  }
   0x1   :  { %11 = sst [smem:[#allocation6]] %s1747_s5 }
   0x2   :  { %12 = vsyncpa [#allocation8], 0 }
   0x3   :  { %14 = vsyncpa [#allocation8 + $0x1], 0  ;;  %s1328_s23 = smov 0   ;;  %s1330_s24 = smov 0  }
   0x4   :  { %s1332_s25 = smov 0   ;;  %s1334_s26 = smov 0  }
   0x5   :  { %s1336_s27 = smov 0   ;;  %s1338_s28 = smov 0  }
   0x6   :  { %s1340_s29 = smov 0   ;;  %s1342_s30 = smov 0  }
   0x7 LB: > { %s889_s5 = sadd.s32 4294967295, %s1283_s30   ;;  %s890_s7 = sadd.s32 4294967294, %s1283_s30   ;;  %s1283_s30 = sphi %s1342_s30, %s20_s30   ;;  %s1279_s29 = sphi %s1340_s29, %s1760_s29   ;;  %s1275_s28 = sphi %s1338_s28, %s1759_s28   ;;  %s1271_s27 = sphi %s1336_s27, %s1758_s27   ;;  %s1267_s26 = sphi %s1334_s26, %s1757_s26   ;;  %s1263_s25 = sphi %s1332_s25, %s1756_s25   ;;  %s1259_s24 = sphi %s1330_s24, %s1755_s24   ;;  %s1255_s23 = sphi %s1328_s23, %s1754_s23  }
   0x8   : > { %s29_s8 = sadd.s32 1, %s1275_s28  ;;  %s32_s9 = sadd.s32 1, %s1279_s29 }
   0x9   : > { %p30_p0 = scmp.ge.s32.totalorder %s29_s8, 2  ;;  %s170_s10 = sadd.s32 1, %s1263_s25 }
   0xa   : > { %p180_p1 = scmp.ne.s32.totalorder %s1263_s25, %s1259_s24  ;;  %p181_p2 = scmp.eq.s32.totalorder %s889_s5, 3 }
   0xb   : > { %s1762_s8 = smov (%p30_p0, %s29_s8), 0  ;;  %s1764_s9 = smov (!%p30_p0, %s32_s9), %s1279_s29 }
   0xc   : > { %s167_s11 = ssub.s32 %s1275_s28, %s1762_s8  ;;  %p1380_p3 = por %p181_p2, %p180_p1 }
   0xd   : > { %p34_p4 = scmp.ge.s32.totalorder %s1764_s9, 2  ;;  %p168_p5 = scmp.eq.s32.totalorder %s167_s11, 0 }
   0xe   : > { %p186_p6 = scmp.ne.s32.totalorder %s1259_s24, %s1255_s23  ;;  %p187_p7 = scmp.eq.s32.totalorder %s890_s7, 3 }
   0xf   : > { %s1766_s9 = smov (%p34_p4, %s1764_s9), 0  ;;  %p893_p9 = scmp.ge.s32.totalorder %s1283_s30, 1 }
  0x10   : > { %s1389_s13 = scalar_select %p168_p5, %s1263_s25, %s170_s10  }
  0x11   : > { %p1391_p8 = por %p187_p7, %p186_p6  ;;  %p229_p10 = scmp.lt.s32.totalorder %s1283_s30, 5 }
  0x13   : > { %p230_p11 = pnand %p893_p9, %p229_p10 }
  0x14   : > { %s256_s15 = sand.u32 (!%p230_p11), 1, %s1259_s24   ;;  %v280_v0 = vld [vmem:[%s1743_s1] sm:$0xff] (!%p230_p11)  ;;  %v281_v1 = vld [vmem:[%s1743_s1 + $0x8] sm:$0xff] (!%p230_p11)  ;;  %v282_v2 = vld [vmem:[%s1743_s1 + $0x10] sm:$0xff] (!%p230_p11)  ;;  %s1408_s22 = sshll.u32 (!%p230_p11), %s1267_s26, 4  ;;  %vm288_vm0 = vcmask (!%p230_p11), 523264  }
  0x15   : > { %233 = sbr.rel (%p230_p11) target bundleno = 690 (0x2b2), region = 44  ;;  %v1052_v3 = vpack.c.bf16 (!%p230_p11), %v281_v1, %v280_v0  ;;  %v283_v4 = vld [vmem:[%s1743_s1 + $0x18] sm:$0xff] (!%p230_p11)  ;;  %p259_p12 = scmp.lt.s32.totalorder (!%p230_p11), %s1408_s22, 31  ;;  %v284_v6 = vld [vmem:[%s1743_s1 + $0x20] sm:$0xff] (!%p230_p11)  ;;  %v285_v7 = vld [vmem:[%s1743_s1 + $0x28] sm:$0xff] (!%p230_p11) }
  0x16   : > { %v1056_v5 = vpack.c.bf16 (!%p230_p11), %v283_v4, %v282_v2  ;;  %v1060_v8 = vpack.c.bf16 (!%p230_p11), %v285_v7, %v284_v6  ;;  %v286_v9 = vld [vmem:[%s1743_s1 + $0x30] sm:$0xff] (!%p230_p11)  ;;  %v287_v10 = vld [vmem:[%s1743_s1 + $0x38] sm:$0xff] (!%p230_p11)  ;;  %p482_p13 = scmp.eq.s32.totalorder (!%p230_p11), %s1271_s27, 0  ;;  %p483_p0 = scmp.eq.s32.totalorder (!%p230_p11), %s1267_s26, 0 }
  0x17   : > { %1053 = vmatprep.subr.bf16.mxu0 (!%p230_p11), %v1052_v3  ;;  %1100 = vmatprep.subr.bf16.mxu1 (!%p230_p11), %v1052_v3  ;;  %v1064_v13 = vpack.c.bf16 (!%p230_p11), %v287_v10, %v286_v9 }
  0x18   : > { %1055 = vmatpush3.bf16.msra.mxu0 (!%p230_p11), %v1052_v3  ;;  %1104 = vmatpush3.bf16.msra.mxu1 (!%p230_p11), %v1052_v3  ;;  %p1468_p1 = pnand (!%p230_p11), %p483_p0, %p482_p13 }
  0x19   : > { %1057 = vmatprep.subr.bf16.mxu0 (!%p230_p11), %v1056_v5  ;;  %1101 = vmatprep.subr.bf16.mxu1 (!%p230_p11), %v1056_v5 }
  0x1c   : > { %s260_s18 = scalar_select %p259_p12, %s1408_s22, 31  ;;  %1059 = vmatpush3.bf16.msra.mxu0 %v1056_v5  ;;  %1105 = vmatpush3.bf16.msra.mxu1 %v1056_v5 }
  0x1d   : > { %1061 = vmatprep.subr.bf16.mxu0 %v1060_v8  ;;  %1102 = vmatprep.subr.bf16.mxu1 %v1060_v8  ;;  %vm488_vm1 = vcmask (!%p1468_p1), 253952   ;;  %v1285_v44 = vmov (!%p1468_p1), 0.0  }
  0x1e   : > { %s895_s19 = sshll.u32 %s260_s18, 3  ;;  %s1506_s18 = scalar_lea.vmem [#allocation7], %s256_s15  ;;  %489 = vst.msk [vmem:[#allocation2] sm:$0x1] (!%p1468_p1), %vm488_vm1, %v1285_v44  ;;  %490 = vst.msk [vmem:[#allocation3] sm:$0x1] (!%p1468_p1), %vm488_vm1, %v1285_v44 }
  0x1f   : > { %s1430_s16 = scalar_lea.vmem %s1742_s0, %s895_s19 }
  0x20   : > { %v264_v11 = vld [vmem:[%s1430_s16] sm:$0xff]  ;;  %1063 = vmatpush3.bf16.msra.mxu0 %v1060_v8  ;;  %1106 = vmatpush3.bf16.msra.mxu1 %v1060_v8  ;;  %v265_v14 = vld [vmem:[%s1430_s16 + $0x8] sm:$0xff]  ;;  %v266_v16 = vld [vmem:[%s1430_s16 + $0x10] sm:$0xff] }
  0x21   : > { %v272_v12 = vld [vmem:[%s1430_s16 + $0x40] sm:$0xff]  ;;  %993 = vmatprep.mubr.msk.f32.mxu0 %vm288_vm0, %v264_v11  ;;  %1065 = vmatprep.subr.bf16.mxu0 %v1064_v13  ;;  %v273_v15 = vld [vmem:[%s1430_s16 + $0x48] sm:$0xff]  ;;  %v274_v17 = vld [vmem:[%s1430_s16 + $0x50] sm:$0xff] }
  0x22   : > { %1005 = vmatprep.mubr.msk.f32.mxu1 %vm288_vm0, %v272_v12  ;;  %1103 = vmatprep.subr.bf16.mxu1 %v1064_v13  ;;  %v267_v18 = vld [vmem:[%s1430_s16 + $0x18] sm:$0xff]  ;;  %v268_v20 = vld [vmem:[%s1430_s16 + $0x20] sm:$0xff]  ;;  %v269_v22 = vld [vmem:[%s1430_s16 + $0x28] sm:$0xff] }
  0x23   : > { %v275_v19 = vld [vmem:[%s1430_s16 + $0x58] sm:$0xff]  ;;  %v276_v21 = vld [vmem:[%s1430_s16 + $0x60] sm:$0xff]  ;;  %v277_v23 = vld [vmem:[%s1430_s16 + $0x68] sm:$0xff] }
  0x24   : > { %1067 = vmatpush3.bf16.msra.mxu0 %v1064_v13  ;;  %1107 = vmatpush3.bf16.msra.mxu1 %v1064_v13  ;;  %v270_v24 = vld [vmem:[%s1430_s16 + $0x30] sm:$0xff]  ;;  %v271_v26 = vld [vmem:[%s1430_s16 + $0x38] sm:$0xff] }
  0x25   : > { %v278_v25 = vld [vmem:[%s1430_s16 + $0x70] sm:$0xff]  ;;  %v279_v27 = vld [vmem:[%s1430_s16 + $0x78] sm:$0xff] }
  0x27   : > { %994 = vmatmul.mubr.msk.f32.vlgmr.msra.gmra.mrb[0].mxu0 %vm288_vm0, %v265_v14  ;;  %1006 = vmatmul.mubr.msk.f32.vlgmr.msra.gmra.mrb[0].mxu1 %vm288_vm0, %v273_v15 }
  0x28   : > { %996 = vmatprep.mubr.msk.f32.mxu0 %vm288_vm0, %v266_v16  ;;  %1008 = vmatprep.mubr.msk.f32.mxu1 %vm288_vm0, %v274_v17 }
  0x2b   : > { %997 = vmatmul.mubr.msk.f32.gmra.mrb[2].mxu0 %vm288_vm0, %v267_v18  ;;  %1009 = vmatmul.mubr.msk.f32.gmra.mrb[2].mxu1 %vm288_vm0, %v275_v19 }
  0x2c   : > { %999 = vmatprep.mubr.msk.f32.mxu0 %vm288_vm0, %v268_v20  ;;  %1011 = vmatprep.mubr.msk.f32.mxu1 %vm288_vm0, %v276_v21 }
  0x2f   : > { %1000 = vmatmul.mubr.msk.f32.gmra.mrb[4].mxu0 %vm288_vm0, %v269_v22  ;;  %1012 = vmatmul.mubr.msk.f32.gmra.mrb[4].mxu1 %vm288_vm0, %v277_v23 }
  0x30   : > { %1002 = vmatprep.mubr.msk.f32.mxu0 %vm288_vm0, %v270_v24  ;;  %1014 = vmatprep.mubr.msk.f32.mxu1 %vm288_vm0, %v278_v25 }
  0x33   : > { %1003 = vmatmul.mubr.msk.f32.gmra.mrb[6].mxu0 %vm288_vm0, %v271_v26  ;;  %1015 = vmatmul.mubr.msk.f32.gmra.mrb[6].mxu1 %vm288_vm0, %v279_v27 }
  0xfa   : > { %v1472_v28 = vpop.f32.mrb[0].mxu0  ;;  %v1474_v29 = vpop.f32.mrb[0].mxu1 }
  0xfb   : > { %v1476_v30 = vpop.f32.mrb[1].mxu0  ;;  %v1478_v31 = vpop.f32.mrb[1].mxu1 }
  0xfe   : > { %v1480_v32 = vpop.f32.mrb[2].mxu0  ;;  %v1482_v33 = vpop.f32.mrb[2].mxu1 }
  0xff   : > { %v1484_v34 = vpop.f32.mrb[3].mxu0  ;;  %v1486_v35 = vpop.f32.mrb[3].mxu1 }
 0x101   : > { %487 = sbr.rel (%p1468_p1) target bundleno = 264 (0x108), region = 48 }
 0x102   : > { %v1488_v36 = vpop.f32.mrb[4].mxu0  ;;  %v1490_v37 = vpop.f32.mrb[4].mxu1 }
 0x103   : > { %v1492_v38 = vpop.f32.mrb[5].mxu0  ;;  %v1494_v39 = vpop.f32.mrb[5].mxu1 }
 0x106   : > { %v1496_v40 = vpop.f32.mrb[6].mxu0  ;;  %v1498_v41 = vpop.f32.mrb[6].mxu1 }
 0x107   : > { %v1500_v42 = vpop.f32.mrb[7].mxu0  ;;  %v1502_v43 = vpop.f32.mrb[7].mxu1 }
 0x108 PF: > { %p912_p2 = scmp.ne.s32.totalorder %s1271_s27, 0 }
 0x109   : > { %vm495_vm2 = vcmask (!%p912_p2), 261120   ;;  %v537_v52 = vmul.f32 (!%p912_p2), %v1476_v30, %v1476_v30  ;;  %v538_v53 = vmul.f32 (!%p912_p2), %v1472_v28, %v1472_v28  ;;  %v539_v55 = vmul.f32 (!%p912_p2), %v1484_v34, %v1484_v34 }
 0x10a   : > { %493 = sbr.rel (%p912_p2) target bundleno = 314 (0x13a), region = 52  ;;  %v496_v45 = vsel (!%p912_p2), %vm495_vm2, %v1476_v30, 0.0  ;;  %v497_v46 = vsel (!%p912_p2), %vm495_vm2, %v1472_v28, 0.0  ;;  %v499_v47 = vsel (!%p912_p2), %vm495_vm2, %v1484_v34, 0.0  ;;  %v501_v49 = vsel (!%p912_p2), %vm495_vm2, %v1480_v32, 0.0 }
 0x10b   : > { %v498_v48 = vadd.f32 (!%p912_p2), %v497_v46, %v496_v45  ;;  %v503_v51 = vsel (!%p912_p2), %vm495_vm2, %v1492_v38, 0.0  ;;  %v505_v56 = vsel (!%p912_p2), %vm495_vm2, %v1488_v36, 0.0  ;;  %v540_v57 = vmul.f32 (!%p912_p2), %v1480_v32, %v1480_v32 }
 0x10c   : > { %v507_v59 = vsel (!%p912_p2), %vm495_vm2, %v1500_v42, 0.0  ;;  %v541_v60 = vmul.f32 (!%p912_p2), %v1492_v38, %v1492_v38  ;;  %v553_v61 = vsel (!%p912_p2), %vm495_vm2, %v537_v52, 0.0  ;;  %v554_v62 = vsel (!%p912_p2), %vm495_vm2, %v538_v53, 0.0 }
 0x10d   : > { %v500_v50 = vadd.f32 (!%p912_p2), %v499_v47, %v498_v48  ;;  %v555_v0 = vadd.f32 (!%p912_p2), %v554_v62, %v553_v61  ;;  %v556_v1 = vsel (!%p912_p2), %vm495_vm2, %v539_v55, 0.0  ;;  %v509_v2 = vsel (!%p912_p2), %vm495_vm2, %v1496_v40, 0.0 }
 0x10e   : > { %v542_v3 = vmul.f32 (!%p912_p2), %v1488_v36, %v1488_v36  ;;  %v558_v4 = vsel (!%p912_p2), %vm495_vm2, %v540_v57, 0.0  ;;  %v511_v7 = vsel (!%p912_p2), %vm495_vm2, %v1478_v31, 0.0  ;;  %v543_v8 = vmul.f32 (!%p912_p2), %v1500_v42, %v1500_v42 }
 0x10f   : > { %v502_v54 = vadd.f32 (!%p912_p2), %v501_v49, %v500_v50  ;;  %v557_v6 = vadd.f32 (!%p912_p2), %v556_v1, %v555_v0  ;;  %v560_v9 = vsel (!%p912_p2), %vm495_vm2, %v541_v60, 0.0  ;;  %v513_v12 = vsel (!%p912_p2), %vm495_vm2, %v1474_v29, 0.0 }
 0x110   : > { %v544_v13 = vmul.f32 (!%p912_p2), %v1496_v40, %v1496_v40  ;;  %v562_v14 = vsel (!%p912_p2), %vm495_vm2, %v542_v3, 0.0  ;;  %v515_v17 = vsel (!%p912_p2), %vm495_vm2, %v1486_v35, 0.0  ;;  %v545_v18 = vmul.f32 (!%p912_p2), %v1478_v31, %v1478_v31 }
 0x111   : > { %v504_v58 = vadd.f32 %v503_v51, %v502_v54  ;;  %v559_v11 = vadd.f32 %v558_v4, %v557_v6  ;;  %v564_v19 = vsel %vm495_vm2, %v543_v8, 0.0  ;;  %v517_v22 = vsel %vm495_vm2, %v1482_v33, 0.0 }
 0x112   : > { %v546_v23 = vmul.f32 %v1474_v29, %v1474_v29  ;;  %v566_v24 = vsel %vm495_vm2, %v544_v13, 0.0  ;;  %v519_v27 = vsel %vm495_vm2, %v1494_v39, 0.0  ;;  %v547_v44 = vmul.f32 %v1486_v35, %v1486_v35 }
 0x113   : > { %v506_v63 = vadd.f32 %v505_v56, %v504_v58  ;;  %v561_v16 = vadd.f32 %v560_v9, %v559_v11  ;;  %v568_v45 = vsel %vm495_vm2, %v545_v18, 0.0  ;;  %v521_v48 = vsel %vm495_vm2, %v1490_v37, 0.0 }
 0x114   : > { %v548_v49 = vmul.f32 %v1482_v33, %v1482_v33  ;;  %v570_v50 = vsel %vm495_vm2, %v546_v23, 0.0  ;;  %v523_v53 = vsel %vm495_vm2, %v1502_v43, 0.0  ;;  %v549_v54 = vmul.f32 %v1494_v39, %v1494_v39 }
 0x115   : > { %v508_v5 = vadd.f32 %v507_v59, %v506_v63  ;;  %v563_v21 = vadd.f32 %v562_v14, %v561_v16  ;;  %v572_v55 = vsel %vm495_vm2, %v547_v44, 0.0  ;;  %v525_v58 = vsel %vm495_vm2, %v1498_v41, 0.0 }
 0x116   : > { %v550_v59 = vmul.f32 %v1490_v37, %v1490_v37  ;;  %v574_v60 = vsel %vm495_vm2, %v548_v49, 0.0  ;;  %v551_v63 = vmul.f32 %v1502_v43, %v1502_v43  ;;  %v576_v0 = vsel %vm495_vm2, %v549_v54, 0.0 }
 0x117   : > { %v510_v10 = vadd.f32 %v509_v2, %v508_v5  ;;  %v565_v26 = vadd.f32 %v564_v19, %v563_v21  ;;  %v552_v3 = vmul.f32 %v1498_v41, %v1498_v41  ;;  %vm534_vm3 = vcmask 253952  }
 0x118   : > { %v578_v4 = vsel %vm495_vm2, %v550_v59, 0.0 }
 0x119   : > { %v512_v15 = vadd.f32 %v511_v7, %v510_v10  ;;  %v567_v47 = vadd.f32 %v566_v24, %v565_v26  ;;  %v580_v7 = vsel %vm495_vm2, %v551_v63, 0.0  ;;  %v582_v10 = vsel %vm495_vm2, %v552_v3, 0.0  ;;  %v536_v24 = vld [vmem:[#allocation3] sm:$0x1] }
 0x11b   : > { %v514_v20 = vadd.f32 %v513_v12, %v512_v15  ;;  %v569_v52 = vadd.f32 %v568_v45, %v567_v47 }
 0x11d   : > { %v516_v25 = vadd.f32 %v515_v17, %v514_v20  ;;  %v571_v57 = vadd.f32 %v570_v50, %v569_v52  ;;  %v494_v17 = vld [vmem:[#allocation2] sm:$0x1] }
 0x11f   : > { %v518_v46 = vadd.f32 %v517_v22, %v516_v25  ;;  %v573_v62 = vadd.f32 %v572_v55, %v571_v57 }
 0x121   : > { %v520_v51 = vadd.f32 %v519_v27, %v518_v46  ;;  %v575_v2 = vadd.f32 %v574_v60, %v573_v62 }
 0x123   : > { %v522_v56 = vadd.f32 %v521_v48, %v520_v51  ;;  %v577_v6 = vadd.f32 %v576_v0, %v575_v2 }
 0x125   : > { %v524_v61 = vadd.f32 %v523_v53, %v522_v56  ;;  %v579_v9 = vadd.f32 %v578_v4, %v577_v6 }
 0x127   : > { %v526_v1 = vadd.f32 %v525_v58, %v524_v61  ;;  %v581_v12 = vadd.f32 %v580_v7, %v579_v9 }
 0x129   : > { %v527_v5 = vrot.slane %v526_v1, 4  ;;  %v583_v14 = vadd.f32 %v582_v10, %v581_v12 }
 0x12b   : > { %v528_v8 = vadd.f32 %v527_v5, %v526_v1  ;;  %v584_v16 = vrot.slane %v583_v14, 4 }
 0x12d   : > { %v529_v11 = vrot.slane %v528_v8, 2  ;;  %v585_v19 = vadd.f32 %v584_v16, %v583_v14 }
 0x12f   : > { %v530_v13 = vadd.f32 %v529_v11, %v528_v8  ;;  %v586_v21 = vrot.slane %v585_v19, 2 }
 0x131   : > { %v531_v15 = vrot.slane %v530_v13, 1  ;;  %v587_v22 = vadd.f32 %v586_v21, %v585_v19 }
 0x133   : > { %v532_v18 = vadd.f32 %v531_v15, %v530_v13  ;;  %v588_v23 = vrot.slane %v587_v22, 1 }
 0x135   : > { %v533_v20 = vadd.f32 %v532_v18, %v494_v17  ;;  %v589_v25 = vadd.f32 %v588_v23, %v587_v22 }
 0x137   : > { %535 = vst.msk [vmem:[#allocation2] sm:$0x1] %vm534_vm3, %v533_v20  ;;  %v590_v26 = vadd.f32 %v589_v25, %v536_v24 }
 0x139   : > { %591 = vst.msk [vmem:[#allocation3] sm:$0x1] %vm534_vm3, %v590_v26 }
 0x13a PF: > { %p592_p4 = scmp.eq.s32.totalorder %s1271_s27, 1 }
 0x13c   : > { %p593_p5 = pnand %p592_p4, %p483_p0 }
 0x13d   : > { %v604_v51 = vld [vmem:[%s1744_s2] sm:$0x1] (!%p593_p5)  ;;  %vm608_vm4 = vcmask (!%p593_p5), 253952  }
 0x13e   : > { %596 = sbr.rel (%p593_p5) target bundleno = 347 (0x15b), region = 56  ;;  %v597_v27 = vld [vmem:[#allocation2] sm:$0x1] (!%p593_p5) }
 0x13f   : > { %v598_v45 = vmul.f32 (!%p593_p5), 0.00390625, %v597_v27  ;;  %v610_v54 = vld [vmem:[%s1745_s3] sm:$0x1] (!%p593_p5) }
 0x140   : > { %v599_v44 = vld [vmem:[#allocation3] sm:$0x1] (!%p593_p5) }
 0x141   : > { %v600_v46 = vmul.f32 (!%p593_p5), 0.00390625, %v599_v44  ;;  %v601_v47 = vmul.f32 (!%p593_p5), %v598_v45, %v598_v45 }
 0x143   : > { %v602_v48 = vsub.f32 (!%p593_p5), %v600_v46, %v601_v47 }
 0x145   : > { %v603_v49 = vmax.f32 %v602_v48, 0.0 }
 0x147   : > { %v605_v50 = vadd.f32 1e-05, %v603_v49 }
 0x149   : > { %1183 = vrsqrt.f32 %v605_v50 }
 0x153   : > { %v1184_v52 = vpop.eup %1183 }
 0x154   : > { %v607_v53 = vmul.f32 %v1184_v52, %v604_v51 }
 0x156   : > { %609 = vst.msk [vmem:[#allocation4] sm:$0x1] %vm608_vm4, %v607_v53  ;;  %v611_v55 = vmul.f32 %v607_v53, %v598_v45 }
 0x158   : > { %v612_v56 = vsub.f32 %v610_v54, %v611_v55 }
 0x15a   : > { %613 = vst.msk [vmem:[#allocation5] sm:$0x1] %vm608_vm4, %v612_v56 }
 0x15b PF: > { %p913_p6 = scmp.ne.s32.totalorder %s1271_s27, 1 }
 0x15c   : > { %v1286_v59 = vmov (!%p913_p6), 0.0|0.0   ;;  %vm682_vm5 = vcmask (!%p913_p6), 261120   ;;  %vm1287_vm7 = vmmov (!%p913_p6), 0   ;;  %v1288_v11 = vmov (!%p913_p6), 0.0   ;;  %s680_s7 = sld [smem:[#allocation6]] (!%p913_p6) }
 0x15d   : > { %616 = sbr.rel (%p913_p6) target bundleno = 666 (0x29a), region = 60  ;;  %v1601_v57 = vld [vmem:[#allocation4] ss:$0 sm:$0xff] (!%p913_p6)  ;;  %1068 = vmatprep.subr.bf16.mxu0 (!%p913_p6), %v1286_v59  ;;  %vm1620_vm6 = vmpackc.low (!%p913_p6), %vm682_vm5, %vm682_vm5  ;;  %1049 = vmatprep.mubr.msk.f32.mxu0 (!%p913_p6), %vm1287_vm7, %v1288_v11 }
 0x15e   : > { %v624_v60 = vmul.f32 (!%p913_p6), %v1601_v57, %v1476_v30  ;;  %v625_v61 = vmul.f32 (!%p913_p6), %v1472_v28, %v1601_v57  ;;  %v626_v62 = vmul.f32 (!%p913_p6), %v1601_v57, %v1484_v34  ;;  %v627_v63 = vmul.f32 (!%p913_p6), %v1480_v32, %v1601_v57 }
 0x15f   : > { %v628_v6 = vmul.f32 (!%p913_p6), %v1601_v57, %v1492_v38  ;;  %v629_v7 = vmul.f32 (!%p913_p6), %v1488_v36, %v1601_v57  ;;  %v630_v38 = vmul.f32 (!%p913_p6), %v1601_v57, %v1500_v42  ;;  %v631_v36 = vmul.f32 (!%p913_p6), %v1496_v40, %v1601_v57 }
 0x160   : > { %v632_v19 = vmul.f32 (!%p913_p6), %v1601_v57, %v1478_v31  ;;  %v633_v42 = vmul.f32 (!%p913_p6), %v1474_v29, %v1601_v57  ;;  %v634_v24 = vmul.f32 (!%p913_p6), %v1601_v57, %v1486_v35  ;;  %v635_v31 = vmul.f32 (!%p913_p6), %v1482_v33, %v1601_v57 }
 0x161   : > { %v1603_v58 = vld [vmem:[#allocation5] ss:$0 sm:$0xff] (!%p913_p6)  ;;  %v636_v45 = vmul.f32 (!%p913_p6), %v1601_v57, %v1494_v39  ;;  %v637_v35 = vmul.f32 (!%p913_p6), %v1490_v37, %v1601_v57  ;;  %v638_v50 = vmul.f32 (!%p913_p6), %v1601_v57, %v1502_v43  ;;  %v639_v39 = vmul.f32 (!%p913_p6), %v1498_v41, %v1601_v57  ;;  %v679_v41 = vld [vmem:[%s1746_s4] sm:$0x1] (!%p913_p6) }
 0x162   : > { %v647_v0 = vadd.f32 (!%p913_p6), %v1603_v58, %v624_v60  ;;  %v648_v1 = vadd.f32 (!%p913_p6), %v1603_v58, %v625_v61  ;;  %v649_v4 = vadd.f32 (!%p913_p6), %v1603_v58, %v626_v62  ;;  %v650_v30 = vadd.f32 (!%p913_p6), %v1603_v58, %v627_v63 }
 0x163   : > { %v651_v9 = vadd.f32 (!%p913_p6), %v1603_v58, %v628_v6  ;;  %v652_v10 = vadd.f32 (!%p913_p6), %v1603_v58, %v629_v7  ;;  %v653_v15 = vadd.f32 (!%p913_p6), %v1603_v58, %v630_v38  ;;  %v654_v16 = vadd.f32 (!%p913_p6), %v1603_v58, %v631_v36 }
 0x164   : > { %v663_v2 = vmax.f32 %v647_v0, 0.0  ;;  %v664_v3 = vmax.f32 %v648_v1, 0.0  ;;  %v665_v32 = vmax.f32 %v649_v4, 0.0  ;;  %v666_v5 = vmax.f32 %v650_v30, 0.0 }
 0x165   : > { %v667_v12 = vmax.f32 %v651_v9, 0.0  ;;  %v668_v13 = vmax.f32 %v652_v10, 0.0  ;;  %v669_v17 = vmax.f32 %v653_v15, 0.0  ;;  %v670_v18 = vmax.f32 %v654_v16, 0.0 }
 0x166   : > { %v1069_v34 = vpack.c.bf16 %v664_v3, %v663_v2  ;;  %v1073_v8 = vpack.c.bf16 %v666_v5, %v665_v32  ;;  %v655_v20 = vadd.f32 %v1603_v58, %v632_v19  ;;  %v656_v21 = vadd.f32 %v1603_v58, %v633_v42 }
 0x167   : > { %v1077_v14 = vpack.c.bf16 %v668_v13, %v667_v12  ;;  %v1081_v40 = vpack.c.bf16 %v670_v18, %v669_v17  ;;  %v657_v25 = vadd.f32 %v1603_v58, %v634_v24  ;;  %v658_v26 = vadd.f32 %v1603_v58, %v635_v31 }
 0x168   : > { %1071 = vmatpush3.bf16.xpose.msk.msra.mxu0 %vm1620_vm6, %v1069_v34  ;;  %v671_v22 = vmax.f32 %v655_v20, 0.0  ;;  %v672_v23 = vmax.f32 %v656_v21, 0.0  ;;  %v659_v46 = vadd.f32 %v1603_v58, %v636_v45  ;;  %v660_v47 = vadd.f32 %v1603_v58, %v637_v35 }
 0x169   : > { %1072 = vmatprep.subr.bf16.mxu0 %v1286_v59  ;;  %v673_v27 = vmax.f32 %v657_v25, 0.0  ;;  %v674_v44 = vmax.f32 %v658_v26, 0.0  ;;  %v661_v51 = vadd.f32 %v1603_v58, %v638_v50  ;;  %v662_v52 = vadd.f32 %v1603_v58, %v639_v39 }
 0x16a   : > { %v1085_v29 = vpack.c.bf16 %v672_v23, %v671_v22  ;;  %v675_v48 = vmax.f32 %v659_v46, 0.0  ;;  %v676_v49 = vmax.f32 %v660_v47, 0.0  ;;  %v681_v43 = vstv %s680_s7 }
 0x16b   : > { %v1089_v33 = vpack.c.bf16 %v674_v44, %v673_v27  ;;  %v677_v53 = vmax.f32 %v661_v51, 0.0  ;;  %v678_v54 = vmax.f32 %v662_v52, 0.0 }
 0x16c   : > { %v1093_v37 = vpack.c.bf16 %v676_v49, %v675_v48 }
 0x16d   : > { %v1097_v55 = vpack.c.bf16 %v678_v54, %v677_v53 }
 0x170   : > { %1075 = vmatpush3.bf16.xpose.msk.msra.mxu0 %vm1620_vm6, %v1073_v8 }
 0x171   : > { %1076 = vmatprep.subr.bf16.mxu0 %v1286_v59 }
 0x178   : > { %1079 = vmatpush3.bf16.xpose.msk.msra.mxu0 %vm1620_vm6, %v1077_v14 }
 0x179   : > { %1080 = vmatprep.subr.bf16.mxu0 %v1286_v59 }
 0x180   : > { %1083 = vmatpush3.bf16.xpose.msk.msra.mxu0 %vm1620_vm6, %v1081_v40 }
 0x181   : > { %1084 = vmatprep.subr.bf16.mxu0 %v1286_v59 }
 0x188   : > { %1087 = vmatpush3.bf16.xpose.msk.msra.mxu0 %vm1620_vm6, %v1085_v29 }
 0x189   : > { %1088 = vmatprep.subr.bf16.mxu0 %v1286_v59 }
 0x190   : > { %1091 = vmatpush3.bf16.xpose.msk.msra.mxu0 %vm1620_vm6, %v1089_v33 }
 0x191   : > { %1092 = vmatprep.subr.bf16.mxu0 %v1286_v59 }
 0x198   : > { %1095 = vmatpush3.bf16.xpose.msk.msra.mxu0 %vm1620_vm6, %v1093_v37 }
 0x199   : > { %1096 = vmatprep.subr.bf16.mxu0 %v1286_v59 }
 0x1a0   : > { %1099 = vmatpush3.bf16.xpose.msk.msra.mxu0 %vm1620_vm6, %v1097_v55 }
 0x1a7   : > { %1050 = vmatmul.mubr.msk.f32.vlgmr.msra.gmra.mrb[0].mxu0 %vm682_vm5, %v679_v41 }
 0x27a   : > { %v800_v56 = vpop.f32.mrb[0].mxu0 }
 0x27b   : > { %v801_v57 = vadd.f32 %v800_v56, %v681_v43  ;;  %v1051_v58 = vpop.f32.mrb[1].mxu0 }
 0x27d   : > { %v804_v60 = vsub.f32 0.0, %v801_v57 }
 0x27f   : > { %v805_v61 = vmul.f32 1.442695, %v804_v60 }
 0x281   : > { %1185 = vpow2.f32 %v805_v61 }
 0x28b   : > { %v1186_v59 = vpop.eup %1185 }
 0x28c   : > { %v807_v62 = vadd.f32 1.0, %v1186_v59 }
 0x28e   : > { %1187 = vrcp.f32 %v807_v62 }
 0x298   : > { %v1188_v63 = vpop.eup %1187 }
 0x299   : > { %809 = vst [vmem:[%s1506_s18] sm:$0x1] %v1188_v63 }
 0x29a PF: > { %s1692_s16 = scalar_lea.hbm %s1748_s6, %s1408_s22  ;;  %s823_s17 = sshll.u32 %s1506_s18, 4  ;;  %s824_s17 = int_to_ptr.vmem [resolvable:$true] %s823_s17 }
 0x29b   : > { %s811_s19 = scalar_lea.sflag [#allocation8], %s256_s15  ;;  %s1189_s20 = scalar_lea.vmem %s824_s17, 16 }
 0x29c   : > { %p1190_p7 = scmp.ne.s32.totalorder %s824_s17, %s1189_s20  ;;  %s1289_s21 = smov [#allocation7]  }
 0x29d   : > { %s1193_s26 = sshll.u32 %s1289_s21, 4  ;;  %s1194_s26 = int_to_ptr.vmem [resolvable:$false] %s1193_s26 }
 0x29e   : > { %p1191_p9 = pnand %p1190_p7, %p1380_p3  ;;  %s1195_s27 = scalar_lea.vmem %s1194_s26, 32 }
 0x29f   : > { %p1196_p11 = scmp.lt.s32.totalorder %s824_s17, %s1194_s26  ;;  %p1197_p12 = scmp.lt.s32.totalorder %s1195_s27, %s1189_s20 }
 0x2a0   : > { %p1192_p10 = pneg %p1191_p9 }
 0x2a1   : > { %p1198_p13 = por %p1197_p12, %p1196_p11 }
 0x2a3   : > { %p1199_p0 = pnand %p1198_p13, %p1192_p10 }
 0x2a5   : > { %1202 = shalt.err (!%p1199_p0)
}
 0x2a6   : > { %s1203_s15 = scalar_lea.hbm %s1692_s16, 16  ;;  %s1207_s5 = scalar_lea.hbm %s1748_s6, 32 }
 0x2a7   : > { %p1204_p1 = scmp.ne.s32.totalorder %s1692_s16, %s1203_s15  ;;  %p1208_p5 = scmp.lt.u32.totalorder %s1692_s16, %s1748_s6 }
 0x2a8   : > { %p1209_p6 = scmp.lt.u32.totalorder %s1207_s5, %s1203_s15  ;;  %p1211_p9 = scmp.lt.u32.totalorder %s1203_s15, %s1692_s16 }
 0x2a9   : > { %p1205_p2 = pnand %p1204_p1, %p1380_p3 }
 0x2aa   : > { %p1210_p7 = por %p1209_p6, %p1208_p5 }
 0x2ab   : > { %p1206_p4 = pneg %p1205_p2 }
 0x2ac   : > { %p1212_p10 = por %p1211_p9, %p1210_p7 }
 0x2ae   : > { %p1213_p11 = pnand %p1212_p10, %p1206_p4 }
 0x2b0   : > { %1216 = shalt.err (!%p1213_p11)
}
 0x2b1   : > { %1108 = dma.vmem_to_hbm [thread:$0]  (%p1380_p3), %s824_s17, 16, %s1692_s16, %s811_s19  }
 0x2b2 PF: > { %p1114_p12 = scmp.ge.s32.totalorder %s1283_s30, 2  ;;  %s835_s11 = sand.u32 1, %s1255_s23  }
 0x2b3   : > { %s836_s20 = scalar_lea.sflag [#allocation8], %s835_s11 }
 0x2b4   : > { %p1111_p13 = pnand %p1114_p12, %p1391_p8 }
 0x2b6   : > { %1250 = dma.done.wait (!%p1111_p13), %s836_s20, 16  }
 0x2b7   : > { %1252 = vsyncadd (!%p1111_p13), %s836_s20, 4294967280  ;;  %s20_s30 = sadd.s32 1, %s1283_s30   ;;  %s1754_s23 = smov %s1259_s24 }
 0x2b8   : > { %p17_p0 = scmp.ge.s32.totalorder %s20_s30, 6   ;;  %s1755_s24 = smov %s1263_s25 }
 0x2b9   : > { %s1756_s25 = smov %s1389_s13  ;;  %s1757_s26 = smov %s1275_s28 }
 0x2ba   : > { %s1758_s27 = smov %s1279_s29  ;;  %s1759_s28 = smov %s1762_s8 }
 0x2bb   : > { %s1760_s29 = smov %s1766_s9  ;;  %19 = sbr.rel (!%p17_p0) target bundleno = 7 (0x7), region = 95 }
 0x2c2   :  { %840 = vsyncpa [#allocation8], 1 }
 0x2c3   :  { %842 = vsyncpa [#allocation8 + $0x1], 1 }

</bundles_post_ra>
